<compile_context>
chip_gen: v5e
topology: v5e:2x2
jax: 0.10.0
libtpu: 0.0.40
codegen_flags: <defaults>
</compile_context>

<pallas_src>
import functools

import jax
import jax.numpy as jnp
from jax.experimental import pallas as pl
from jax.experimental.pallas import tpu as pltpu

_LANES = 128            # minor (lane) dim of the 2-D slab
_MAX_BLOCK_ROWS = 8192  # 8192 x 128 x 4 B = 4 MiB per f32 input block


def _static_pow(x, gamma):
    """x**gamma as a multiply chain for small non-negative integer gamma
    (avoids the exp(gamma*log(x)) lowering of a float pow)."""
    g = float(gamma)
    if g == int(g) and 0 <= int(g) <= 8:
        gi = int(g)
        if gi == 0:
            return jnp.ones_like(x)
        out = x
        for _ in range(gi - 1):
            out = out * x
        return out
    return x ** g  # general (non-integer) gamma fallback


def _focal_terms(p, t, gamma):
    """(1 - pt)**gamma * s with s = -bce; the sign (and alpha/N) is folded into
    the wrapper-side scale.  Matches PyTorch BCELoss (log clamp at -100) +
    pt = exp(-bce) semantics exactly."""
    log_p = jnp.maximum(jnp.log(p), -100.0)
    log_1mp = jnp.maximum(jnp.log(1.0 - p), -100.0)
    s = t * (log_p - log_1mp) + log_1mp      # == -(bce)
    pt = jnp.exp(s)                          # == exp(-bce)
    return _static_pow(1.0 - pt, gamma) * s


def _focal_partial_kernel(p_ref, t_ref, out_ref, *, gamma, block_rows,
                          total_rows, needs_mask):
    # Cast in-kernel so HBM traffic stays at the input's native width.
    p = p_ref[...].astype(jnp.float32)
    t = t_ref[...].astype(jnp.float32)

    contrib = _focal_terms(p, t, gamma)

    if needs_mask:
        # Last grid block may extend past the real row count; OOB VMEM rows can
        # hold garbage (possibly NaN/Inf after the math) -> select them to 0
        # strictly before the sum.
        row = pl.program_id(0) * block_rows + jax.lax.broadcasted_iota(
            jnp.int32, contrib.shape, 0)
        contrib = jnp.where(row < total_rows, contrib, 0.0)

    # Per-block partial sum over rows only; cross-lane / cross-block reduction
    # and the (-alpha/N) scale are applied once in the wrapper.
    out_ref[...] = jnp.sum(contrib, axis=0, keepdims=True).reshape(1, 1, _LANES)


def _choose_block_rows(rows):
    if rows <= 16:
        return rows  # single full-extent block (legal even if rows % 8 != 0)
    # Keep at least 2 grid steps (both v7x TensorCores get work), sublane-align,
    # and cap at 4 MiB/operand blocks.
    half = -(-rows // 2)
    half = -(-half // 8) * 8
    return min(_MAX_BLOCK_ROWS, half)


def vanilla_focal_loss(inputs, targets, alpha=0.25, gamma=2.0):
    """Pallas implementation of VaniliaFocalLoss.forward.

    inputs:  probabilities in (0, 1), any shape/dtype.
    targets: same shape, values in [0, 1].
    Returns a scalar f32 (mean focal loss).
    """
    assert inputs.shape == targets.shape
    n_valid = int(inputs.size)
    assert n_valid > 0

    p_flat = jnp.reshape(inputs, (-1,))
    t_flat = jnp.reshape(targets, (-1,))

    rows = n_valid // _LANES
    rem = n_valid % _LANES

    total = jnp.float32(0.0)

    if rows > 0:
        head = rows * _LANES
        if rem:
            p_head = jax.lax.slice(p_flat, (0,), (head,))
            t_head = jax.lax.slice(t_flat, (0,), (head,))
        else:
            p_head, t_head = p_flat, t_flat
        p2 = p_head.reshape(rows, _LANES)
        t2 = t_head.reshape(rows, _LANES)

        block_rows = _choose_block_rows(rows)
        grid_rows = pl.cdiv(rows, block_rows)
        needs_mask = (rows % block_rows) != 0

        kernel = functools.partial(
            _focal_partial_kernel,
            gamma=float(gamma),
            block_rows=block_rows,
            total_rows=rows,
            needs_mask=needs_mask,
        )

        elems = rows * _LANES
        cost = pl.CostEstimate(
            flops=12 * elems,
            transcendentals=3 * elems,
            bytes_accessed=int(p2.size * p2.dtype.itemsize
                               + t2.size * t2.dtype.itemsize
                               + grid_rows * _LANES * 4),
        )

        partials = pl.pallas_call(
            kernel,
            out_shape=jax.ShapeDtypeStruct((grid_rows, 1, _LANES), jnp.float32),
            grid_spec=pltpu.PrefetchScalarGridSpec(
                num_scalar_prefetch=0,
                grid=(grid_rows,),
                in_specs=[
                    pl.BlockSpec((block_rows, _LANES), lambda i: (i, 0)),
                    pl.BlockSpec((block_rows, _LANES), lambda i: (i, 0)),
                ],
                out_specs=pl.BlockSpec((1, 1, _LANES), lambda i: (i, 0, 0)),
            ),
            compiler_params=pltpu.CompilerParams(
                dimension_semantics=("parallel",),  # independent blocks
                vmem_limit_bytes=48 * 1024 * 1024,  # headroom for 16 MiB of buffers (v5e default too low)
            ),
            cost_estimate=cost,
        )(p2, t2)

        total = total + jnp.sum(partials)

    if rem:
        # <=127-element tail: reduce with plain JAX (no full-array pad/copy).
        tail_p = jax.lax.slice(p_flat, (rows * _LANES,), (n_valid,)).astype(jnp.float32)
        tail_t = jax.lax.slice(t_flat, (rows * _LANES,), (n_valid,)).astype(jnp.float32)
        total = total + jnp.sum(_focal_terms(tail_p, tail_t, float(gamma)))

    # Contributions are (1-pt)**gamma * (-bce): fold the sign, alpha, and the
    # mean normalization into one scale.
    return total * jnp.float32(-float(alpha) / n_valid)


def _reference_focal_loss(inputs, targets, alpha=0.25, gamma=2.0):
    p = inputs.astype(jnp.float32)
    t = targets.astype(jnp.float32)
    log_p = jnp.maximum(jnp.log(p), -100.0)
    log_1mp = jnp.maximum(jnp.log(1.0 - p), -100.0)
    bce = -(t * log_p + (1.0 - t) * log_1mp)
    pt = jnp.exp(-bce)
    return jnp.mean(alpha * (1.0 - pt) ** gamma * bce)


if __name__ == "__main__":
    key = jax.random.PRNGKey(0)
    k1, k2 = jax.random.split(key)

    # Small NCHW-shaped example (occupancy probabilities after sigmoid).
    shape = (2, 4, 16, 16)
    logits = jax.random.normal(k1, shape, dtype=jnp.float32)
    inputs = jax.nn.sigmoid(logits)                       # probabilities in (0,1)
    targets = jax.random.bernoulli(k2, 0.5, shape).astype(jnp.float32)

    loss = vanilla_focal_loss(inputs, targets, alpha=0.25, gamma=2.0)
    loss = jax.block_until_ready(loss)

    ref = _reference_focal_loss(inputs, targets, alpha=0.25, gamma=2.0)
    assert jnp.allclose(loss, ref, rtol=1e-5, atol=1e-6), (loss, ref)

    print("KERNEL_OK")
</pallas_src>

<mosaic_0001>
module attributes {stable_mosaic.version = 11 : i64} {
  func.func @_focal_partial_kernel(%arg0: i32, %arg1: memref<16x128xf32, #tpu.memory_space<vmem>>, %arg2: memref<16x128xf32, #tpu.memory_space<vmem>>, %arg3: memref<1x1x128xf32, #tpu.memory_space<vmem>>) attributes {dimension_semantics = [#tpu.dimension_semantics<parallel>], iteration_bounds = array<i64: 1>, scalar_prefetch = 0 : i64, scratch_operands = 0 : i64, tpu.core_type = #tpu.core_type<tc>, window_params = [{transform_indices = @transform_0, window_bounds = array<i64: 16, 128>}, {transform_indices = @transform_1, window_bounds = array<i64: 16, 128>}, {transform_indices = @transform_2, window_bounds = array<i64: 1, 1, 128>}]} {
    %c0 = arith.constant 0 : index
    %c0_0 = arith.constant 0 : index
    %0 = vector.load %arg1[%c0, %c0_0] : memref<16x128xf32, #tpu.memory_space<vmem>>, vector<16x128xf32>
    %c0_1 = arith.constant 0 : index
    %c0_2 = arith.constant 0 : index
    %1 = vector.load %arg2[%c0_1, %c0_2] : memref<16x128xf32, #tpu.memory_space<vmem>>, vector<16x128xf32>
    %2 = math.log %0 : vector<16x128xf32>
    %cst = arith.constant -1.000000e+02 : f32
    %3 = vector.broadcast %cst : f32 to vector<16x128xf32>
    %4 = arith.maximumf %2, %3 : vector<16x128xf32>
    %cst_3 = arith.constant 1.000000e+00 : f32
    %5 = vector.broadcast %cst_3 : f32 to vector<16x128xf32>
    %6 = arith.subf %5, %0 : vector<16x128xf32>
    %7 = math.log %6 : vector<16x128xf32>
    %cst_4 = arith.constant -1.000000e+02 : f32
    %8 = vector.broadcast %cst_4 : f32 to vector<16x128xf32>
    %9 = arith.maximumf %7, %8 : vector<16x128xf32>
    %10 = arith.subf %4, %9 : vector<16x128xf32>
    %11 = arith.mulf %1, %10 : vector<16x128xf32>
    %12 = arith.addf %11, %9 : vector<16x128xf32>
    %13 = math.exp %12 : vector<16x128xf32>
    %cst_5 = arith.constant 1.000000e+00 : f32
    %14 = vector.broadcast %cst_5 : f32 to vector<16x128xf32>
    %15 = arith.subf %14, %13 : vector<16x128xf32>
    %16 = arith.mulf %15, %15 : vector<16x128xf32>
    %17 = arith.mulf %16, %12 : vector<16x128xf32>
    %cst_6 = arith.constant dense<0.000000e+00> : vector<128xf32>
    %18 = vector.multi_reduction <add>, %17, %cst_6 [0] : vector<16x128xf32> to vector<128xf32>
    %19 = vector.shape_cast %18 : vector<128xf32> to vector<1x128xf32>
    %20 = vector.shape_cast %19 : vector<1x128xf32> to vector<1x1x128xf32>
    %c0_7 = arith.constant 0 : index
    %c0_8 = arith.constant 0 : index
    %c0_9 = arith.constant 0 : index
    %21 = vector.load %arg3[%c0_7, %c0_8, %c0_9] : memref<1x1x128xf32, #tpu.memory_space<vmem>>, vector<1x1x128xf32>
    tpu.vector_store %arg3[%c0_7, %c0_8, %c0_9], %20 {strides = array<i32>} : memref<1x1x128xf32, #tpu.memory_space<vmem>>, vector<1x1x128xf32>,
    return
  }
  func.func @transform_0(%arg0: i32) -> (i32, i32) {
    %c0_i32 = arith.constant 0 : i32
    %c0_i32_0 = arith.constant 0 : i32
    return %arg0, %c0_i32 : i32, i32
  }
  func.func @transform_1(%arg0: i32) -> (i32, i32) {
    %c0_i32 = arith.constant 0 : i32
    %c0_i32_0 = arith.constant 0 : i32
    return %arg0, %c0_i32 : i32, i32
  }
  func.func @transform_2(%arg0: i32) -> (i32, i32, i32) {
    %c0_i32 = arith.constant 0 : i32
    %c0_i32_0 = arith.constant 0 : i32
    %c0_i32_1 = arith.constant 0 : i32
    return %arg0, %c0_i32, %c0_i32_0 : i32, i32, i32
  }
}

</mosaic_0001>

<bundles_post_ra>
// kernel: tpu_custom_call.1
= control target key start
LH: loop header
LB: loop body
LE: loop exit
PB: predicated region body
PF: predicated region fallthrough
CT: control target
= control target key end

     0   :  { %7 = vsyncpa [#allocation3], 0  ;;  %s228_s0 = inlined_call_operand.hbm [shape: f32[16,128], index: 0, kind: input, shape index: {}]   ;;  %s229_s1 = inlined_call_operand.hbm [shape: f32[16,128], index: 1, kind: input, shape index: {}]   ;;  %s230_s2 = inlined_call_operand.hbm [shape: f32[1,1,128], index: 2, kind: output, shape index: {}]  }
   0x1   :  { %8 = vsyncpa [#allocation6], 0 }
   0x2   :  { %9 = vsyncpa [#allocation4], 0  ;;  %s14_s11 = sshll.u32 %s228_s0, 4  ;;  %s199_s12 = smov [#allocation2]   ;;  %s15_s11 = int_to_ptr.hbm [resolvable:$true] %s14_s11 }
   0x3   :  { %s16_s13 = sshll.u32 %s199_s12, 4  ;;  %s27_s16 = sshll.u32 %s229_s1, 4  ;;  %s17_s13 = int_to_ptr.vmem [resolvable:$true] %s16_s13  ;;  %s28_s16 = int_to_ptr.hbm [resolvable:$true] %s27_s16 }
   0x4   :  { %s200_s17 = smov 128   ;;  %s201_s18 = smov 8  }
   0x5   :  { %22 = dma.hbm_to_vmem [thread:$0]  %s15_s11, 256, %s17_s13, [#allocation3], %s200_s17, %s200_s17, %s201_s18  }
   0x6   :  { %s202_s19 = smov [#allocation5]  }
   0x7   :  { %s29_s20 = sshll.u32 %s202_s19, 4  ;;  %s30_s20 = int_to_ptr.vmem [resolvable:$true] %s29_s20 }
   0x8   :  { %35 = dma.hbm_to_vmem [thread:$0]  %s28_s16, 256, %s30_s20, [#allocation6], %s200_s17, %s200_s17, %s201_s18  }
   0x9   :  { %193 = dma.done.wait [#allocation3], 256  }
   0xa   :  { %194 = vsyncadd [#allocation3], 4294967040 }
   0xb   :  { %195 = dma.done.wait [#allocation6], 256  }
   0xc   :  { %196 = vsyncadd [#allocation6], 4294967040  ;;  %v44_v0 = vld [vmem:[#allocation2] sm:$0xff]  ;;  %v45_v1 = vld [vmem:[#allocation2 + $0x8] sm:$0xff]  ;;  %s203_s0 = smov [#allocation7]   ;;  %s93_s23 = sshll.u32 %s230_s2, 4  ;;  %s94_s23 = int_to_ptr.hbm [resolvable:$true] %s93_s23 }
   0xd   :  { %109 = vlog2.f32 %v44_v0  ;;  %v54_v2 = vsub.f32 1.0, %v44_v0  ;;  %v55_v3 = vsub.f32 1.0, %v45_v1  ;;  %v46_v15 = vld [vmem:[#allocation5] sm:$0xff]  ;;  %v47_v17 = vld [vmem:[#allocation5 + $0x8] sm:$0xff]  ;;  %s91_s1 = sshll.u32 %s203_s0, 4  ;;  %s92_s1 = int_to_ptr.vmem [resolvable:$true] %s91_s1 }
   0xe   :  { %111 = vlog2.f32 %v45_v1 }
   0xf   :  { %113 = vlog2.f32 %v54_v2 }
  0x10   :  { %115 = vlog2.f32 %v55_v3 }
  0x13   :  { %v110_v4 = vpop.eup %109 }
  0x14   :  { %v112_v5 = vpop.eup %111  ;;  %v49_v6 = vmul.f32 0.6931472, %v110_v4 }
  0x15   :  { %v114_v7 = vpop.eup %113  ;;  %v51_v8 = vmul.f32 0.6931472, %v112_v5 }
  0x16   :  { %v116_v9 = vpop.eup %115  ;;  %v52_v10 = vmax.f32 %v49_v6, -100.0  ;;  %v57_v11 = vmul.f32 0.6931472, %v114_v7 }
  0x17   :  { %v53_v12 = vmax.f32 %v51_v8, -100.0  ;;  %v59_v13 = vmul.f32 0.6931472, %v116_v9 }
  0x18   :  { %v60_v14 = vmax.f32 %v57_v11, -100.0 }
  0x19   :  { %v61_v16 = vmax.f32 %v59_v13, -100.0 }
  0x1a   :  { %v62_v18 = vsub.f32 %v52_v10, %v60_v14 }
  0x1b   :  { %v63_v19 = vsub.f32 %v53_v12, %v61_v16 }
  0x1c   :  { %v64_v20 = vmul.f32 %v62_v18, %v46_v15 }
  0x1d   :  { %v65_v21 = vmul.f32 %v63_v19, %v47_v17 }
  0x1e   :  { %v66_v22 = vadd.f32 %v64_v20, %v60_v14 }
  0x1f   :  { %v67_v23 = vadd.f32 %v65_v21, %v61_v16 }
  0x20   :  { %v68_v24 = vmul.f32 1.442695, %v66_v22 }
  0x21   :  { %v70_v25 = vmul.f32 1.442695, %v67_v23 }
  0x22   :  { %117 = vpow2.f32 %v68_v24 }
  0x23   :  { %119 = vpow2.f32 %v70_v25 }
  0x28   :  { %v118_v26 = vpop.eup %117 }
  0x29   :  { %v120_v27 = vpop.eup %119  ;;  %v72_v28 = vsub.f32 1.0, %v118_v26 }
  0x2a   :  { %v73_v29 = vsub.f32 1.0, %v120_v27 }
  0x2b   :  { %v74_v30 = vmul.f32 %v72_v28, %v72_v28 }
  0x2c   :  { %v75_v31 = vmul.f32 %v73_v29, %v73_v29 }
  0x2d   :  { %v76_v32 = vmul.f32 %v74_v30, %v66_v22 }
  0x2e   :  { %v77_v33 = vmul.f32 %v75_v31, %v67_v23 }
  0x30   :  { %v78_v34 = vadd.f32 %v77_v33, %v76_v32 }
  0x32   :  { %v79_v35 = vrot.slane %v78_v34, 4 }
  0x34   :  { %v80_v36 = vadd.f32 %v79_v35, %v78_v34 }
  0x36   :  { %v81_v37 = vrot.slane %v80_v36, 2 }
  0x38   :  { %v82_v38 = vadd.f32 %v81_v37, %v80_v36 }
  0x3a   :  { %v83_v39 = vrot.slane %v82_v38, 1 }
  0x3c   :  { %v84_v40 = vadd.f32 %v83_v39, %v82_v38 }
  0x3e   :  { %85 = vst [vmem:[#allocation7] sm:$0x1] %v84_v40 }
  0x3f   :  { %96 = dma.vmem_to_hbm [thread:$0]  %s92_s1, 16, %s94_s23, [#allocation4]  }
  0x40   :  { %197 = dma.done.wait [#allocation4], 16  }
  0x41   :  { %198 = vsyncadd [#allocation4], 4294967280 }
  0x42   :  { %101 = vsyncpa [#allocation3], 1 }
  0x43   :  { %102 = vsyncpa [#allocation6], 1 }
  0x44   :  { %103 = vsyncpa [#allocation4], 1 }

</bundles_post_ra>
